<compile_context>
chip_gen: v5e
topology: v5e:2x2
jax: 0.10.0
libtpu: 0.0.40
codegen_flags: <defaults>
</compile_context>

<pallas_src>
import functools

import jax
import jax.numpy as jnp
import numpy as np
from jax.experimental import pallas as pl
from jax.experimental.pallas import tpu as pltpu


# --------------------------------------------------------------------------
# Fused kernel: conv (single matmul) + BatchNorm(batch stats) + ReLU.
#   p_ref:   (KK*Cin, N*M)   im2col patches, batch*spatial flattened on lanes
#   w_ref:   (Cout, KK*Cin)  conv weights, contraction order (kh, kw, cin)
#   gb_ref:  (Cout, 2)       packed per-channel params: [:, 0] = gamma, [:, 1] = beta
#   o_ref:   (N, Cout, M)    output in NCHW order (M = Ho*Wo, lane-dense)
# --------------------------------------------------------------------------
def conv_bn_relu_kernel(p_ref, w_ref, gb_ref, o_ref, *, eps):
    n_out, _, m = o_ref.shape
    total = n_out * m

    # Single MXU matmul: (Cout, KK*Cin) @ (KK*Cin, N*M) -> (Cout, N*M), f32 accumulate.
    # NOTE: the Conv2d bias is intentionally NOT added -- under training-mode batch
    # statistics it is exactly cancelled by the mean subtraction below.
    y = jnp.dot(w_ref[...], p_ref[...], preferred_element_type=jnp.float32)

    # BatchNorm training-mode stats over (N, H, W) == the lane axis.
    # Single-pass (E[y^2] - mean^2): one lane reduction sweep fewer than the centered
    # form; safe because the reduction length is 512 with f32 accumulation and the
    # conv outputs are O(1).
    inv_total = 1.0 / total
    mean = jnp.sum(y, axis=-1, keepdims=True) * inv_total
    mean_sq = jnp.sum(y * y, axis=-1, keepdims=True) * inv_total
    var = mean_sq - mean * mean

    # Folded affine: out = max(y*scale + shift, 0)  (rsqrt runs on the EUP slot)
    gamma = gb_ref[:, 0:1]
    beta = gb_ref[:, 1:2]
    scale = gamma * jax.lax.rsqrt(var + eps)
    shift = beta - mean * scale
    out = jnp.maximum(y * scale + shift, 0.0)

    # Lane-dense stores, already NCHW-ordered; N is tiny -> static unroll.
    # (m is a multiple of 128, so the column slice stays vreg-aligned -> unmasked vst.)
    for n in range(n_out):
        o_ref[n] = out[:, n * m:(n + 1) * m].astype(o_ref.dtype)


# --------------------------------------------------------------------------
# Wrapper: layout glue (pad, im2col, weight reshape) in plain JAX, everything
# hot (matmul, BN reduction, normalize, ReLU, stores) in the single Pallas call.
# Jitted so the glue fuses into one executable (no eager per-op HBM round trips).
# --------------------------------------------------------------------------
@functools.partial(jax.jit, static_argnames=("padding", "eps"))
def conv_bn_relu(x_nchw, weight_oihw, bias, gamma, beta, *, padding=1, eps=1e-5):
    # `bias` is accepted for parameter-fidelity with nn.Conv2d but is mathematically
    # a no-op under training-mode BatchNorm, so it is not passed to the kernel.
    del bias

    N, Cin, H, W = x_nchw.shape
    Cout, _, KH, KW = weight_oihw.shape

    # Channel-first padded input: (Cin, N, Hp, Wp).
    x_cn = jnp.transpose(x_nchw, (1, 0, 2, 3))
    x_pad = jnp.pad(x_cn, ((0, 0), (0, 0), (padding, padding), (padding, padding)))
    Hp, Wp = x_pad.shape[2], x_pad.shape[3]
    Ho, Wo = Hp - KH + 1, Wp - KW + 1
    M = Ho * Wo
    KK = KH * KW

    # Guard the in-kernel store-loop layout assumption (lane-aligned column slices).
    if M % 128 != 0:
        # TODO(synk): pad M up to a multiple of 128 (or emit a (Cout, N*M) output and
        #             reshape in the wrapper) for shapes where Ho*Wo isn't 128-aligned.
        raise NotImplementedError(
            f"Ho*Wo = {M} must be a multiple of 128 for lane-dense NCHW stores.")

    # im2col: (KK*Cin, N*M); column index = n*M + h*Wo + w (lane axis, mult. of 128).
    # Host-side only because the problem is tiny (72 KB); see TODO at top for scaling.
    patches = jnp.stack(
        [
            x_pad[:, :, kh:kh + Ho, kw:kw + Wo].reshape(Cin, N * M)
            for kh in range(KH)
            for kw in range(KW)
        ],
        axis=0,
    ).reshape(KK * Cin, N * M)

    # OIHW -> (Cout, KH*KW*Cin), matching the patches' (kh, kw, cin) contraction order.
    w2d = jnp.transpose(weight_oihw, (0, 2, 3, 1)).reshape(Cout, KK * Cin)

    # Pack per-channel BN params into one operand -> one prologue DMA instead of two.
    gb = jnp.stack(
        [gamma.astype(jnp.float32), beta.astype(jnp.float32)], axis=1)  # (Cout, 2)

    out = pl.pallas_call(
        functools.partial(conv_bn_relu_kernel, eps=eps),
        out_shape=jax.ShapeDtypeStruct((N, Cout, M), jnp.float32),
        grid=(1,),
        in_specs=[
            pl.BlockSpec((KK * Cin, N * M), lambda i: (0, 0)),
            pl.BlockSpec((Cout, KK * Cin), lambda i: (0, 0)),
            pl.BlockSpec((Cout, 2), lambda i: (0, 0)),
        ],
        out_specs=pl.BlockSpec((N, Cout, M), lambda i: (0, 0, 0)),
        compiler_params=pltpu.CompilerParams(dimension_semantics=("arbitrary",)),
    )(patches.astype(jnp.float32), w2d.astype(jnp.float32), gb)

    # Already NCHW-ordered: just un-flatten spatial. No transpose needed.
    return out.reshape(N, Cout, Ho, Wo)


# --------------------------------------------------------------------------
# Pure-JAX reference (matches PyTorch training-mode forward semantics,
# including the conv bias -- which the BN mean subtraction cancels).
# --------------------------------------------------------------------------
def reference(x_nchw, weight_oihw, bias, gamma, beta, *, padding=1, eps=1e-5):
    y = jax.lax.conv_general_dilated(
        x_nchw, weight_oihw, window_strides=(1, 1),
        padding=[(padding, padding), (padding, padding)],
        dimension_numbers=("NCHW", "OIHW", "NCHW"),
    )
    y = y + bias[None, :, None, None]
    mean = jnp.mean(y, axis=(0, 2, 3), keepdims=True)
    var = jnp.mean((y - mean) ** 2, axis=(0, 2, 3), keepdims=True)  # biased var
    yn = (y - mean) / jnp.sqrt(var + eps)
    yn = yn * gamma[None, :, None, None] + beta[None, :, None, None]
    return jnp.maximum(yn, 0.0)


if __name__ == "__main__":
    N, Cin, H, W = 2, 4, 16, 16
    Cout, KH, KW = 8, 3, 3

    key = jax.random.PRNGKey(0)
    kx, kw, kb = jax.random.split(key, 3)

    x = jax.random.normal(kx, (N, Cin, H, W), dtype=jnp.float32)
    fan_in = Cin * KH * KW
    weight = jax.random.normal(kw, (Cout, Cin, KH, KW), dtype=jnp.float32) / np.sqrt(fan_in)
    bias = 0.1 * jax.random.normal(kb, (Cout,), dtype=jnp.float32)
    gamma = jnp.ones((Cout,), jnp.float32)   # PyTorch BatchNorm2d default affine init
    beta = jnp.zeros((Cout,), jnp.float32)

    out = conv_bn_relu(x, weight, bias, gamma, beta, padding=1)
    out = jax.block_until_ready(out)

    ref = jax.block_until_ready(reference(x, weight, bias, gamma, beta, padding=1))

    assert out.shape == (N, Cout, H, W), out.shape
    np.testing.assert_allclose(np.asarray(out), np.asarray(ref), atol=2e-3, rtol=2e-3)

    print("KERNEL_OK")
</pallas_src>

<mosaic_0001>
module attributes {stable_mosaic.version = 11 : i64} {
  func.func @conv_bn_relu_kernel(%arg0: i32, %arg1: memref<36x512xf32, #tpu.memory_space<vmem>>, %arg2: memref<8x36xf32, #tpu.memory_space<vmem>>, %arg3: memref<8x2xf32, #tpu.memory_space<vmem>>, %arg4: memref<2x8x256xf32, #tpu.memory_space<vmem>>) attributes {dimension_semantics = [#tpu.dimension_semantics<arbitrary>], iteration_bounds = array<i64: 1>, scalar_prefetch = 0 : i64, scratch_operands = 0 : i64, tpu.core_type = #tpu.core_type<tc>, window_params = [{pipeline_mode = #tpu.pipeline_mode<synchronous>, transform_indices = @transform_0, window_bounds = array<i64: 36, 512>}, {pipeline_mode = #tpu.pipeline_mode<synchronous>, transform_indices = @transform_1, window_bounds = array<i64: 8, 36>}, {pipeline_mode = #tpu.pipeline_mode<synchronous>, transform_indices = @transform_2, window_bounds = array<i64: 8, 2>}, {pipeline_mode = #tpu.pipeline_mode<synchronous>, transform_indices = @transform_3, window_bounds = array<i64: 2, 8, 256>}]} {
    %c0 = arith.constant 0 : index
    %c0_0 = arith.constant 0 : index
    %0 = vector.load %arg2[%c0, %c0_0] : memref<8x36xf32, #tpu.memory_space<vmem>>, vector<8x36xf32>
    %c0_1 = arith.constant 0 : index
    %c0_2 = arith.constant 0 : index
    %1 = vector.load %arg1[%c0_1, %c0_2] : memref<36x512xf32, #tpu.memory_space<vmem>>, vector<36x512xf32>
    %cst = arith.constant dense<0.000000e+00> : vector<8x512xf32>
    %2 = tpu.matmul %0, %1, %cst {dimension_numbers = #tpu.dot_dimension_numbers<[1], [0], [0], [1], [0, 0, 1, 1], [], []>} : vector<8x36xf32>, vector<36x512xf32>, vector<8x512xf32> -> vector<8x512xf32>
    %cst_3 = arith.constant dense<0.000000e+00> : vector<8xf32>
    %3 = vector.multi_reduction <add>, %2, %cst_3 [1] : vector<8x512xf32> to vector<8xf32>
    %4 = vector.shape_cast %3 : vector<8xf32> to vector<8x1xf32>
    %cst_4 = arith.constant 0.001953125 : f32
    %5 = vector.broadcast %cst_4 : f32 to vector<8x1xf32>
    %6 = arith.mulf %4, %5 : vector<8x1xf32>
    %7 = arith.mulf %2, %2 : vector<8x512xf32>
    %cst_5 = arith.constant dense<0.000000e+00> : vector<8xf32>
    %8 = vector.multi_reduction <add>, %7, %cst_5 [1] : vector<8x512xf32> to vector<8xf32>
    %9 = vector.shape_cast %8 : vector<8xf32> to vector<8x1xf32>
    %cst_6 = arith.constant 0.001953125 : f32
    %10 = vector.broadcast %cst_6 : f32 to vector<8x1xf32>
    %11 = arith.mulf %9, %10 : vector<8x1xf32>
    %12 = arith.mulf %6, %6 : vector<8x1xf32>
    %13 = arith.subf %11, %12 : vector<8x1xf32>
    %c0_7 = arith.constant 0 : index
    %c0_8 = arith.constant 0 : index
    %14 = vector.load %arg3[%c0_7, %c0_8] : memref<8x2xf32, #tpu.memory_space<vmem>>, vector<8x1xf32>
    %c0_9 = arith.constant 0 : index
    %c1 = arith.constant 1 : index
    %15 = vector.load %arg3[%c0_9, %c1] : memref<8x2xf32, #tpu.memory_space<vmem>>, vector<8x1xf32>
    %cst_10 = arith.constant 9.99999974E-6 : f32
    %16 = vector.broadcast %cst_10 : f32 to vector<8x1xf32>
    %17 = arith.addf %13, %16 : vector<8x1xf32>
    %18 = math.rsqrt %17 : vector<8x1xf32>
    %19 = arith.mulf %14, %18 : vector<8x1xf32>
    %20 = arith.mulf %6, %19 : vector<8x1xf32>
    %21 = arith.subf %15, %20 : vector<8x1xf32>
    %22 = vector.broadcast %19 : vector<8x1xf32> to vector<8x512xf32>
    %23 = arith.mulf %2, %22 : vector<8x512xf32>
    %24 = vector.broadcast %21 : vector<8x1xf32> to vector<8x512xf32>
    %25 = arith.addf %23, %24 : vector<8x512xf32>
    %cst_11 = arith.constant 0.000000e+00 : f32
    %26 = vector.broadcast %cst_11 : f32 to vector<8x512xf32>
    %27 = arith.maximumf %25, %26 : vector<8x512xf32>
    %28 = vector.extract_strided_slice %27 {offsets = [0, 0], sizes = [8, 256], strides = [1, 1]} : vector<8x512xf32> to vector<8x256xf32>
    %c0_12 = arith.constant 0 : index
    %c0_13 = arith.constant 0 : index
    %c0_14 = arith.constant 0 : index
    %29 = vector.load %arg4[%c0_12, %c0_13, %c0_14] : memref<2x8x256xf32, #tpu.memory_space<vmem>>, vector<1x8x256xf32>
    %30 = vector.shape_cast %29 : vector<1x8x256xf32> to vector<8x256xf32>
    %31 = vector.shape_cast %28 : vector<8x256xf32> to vector<1x8x256xf32>
    tpu.vector_store %arg4[%c0_12, %c0_13, %c0_14], %31 {strides = array<i32>} : memref<2x8x256xf32, #tpu.memory_space<vmem>>, vector<1x8x256xf32>,
    %32 = vector.extract_strided_slice %27 {offsets = [0, 256], sizes = [8, 256], strides = [1, 1]} : vector<8x512xf32> to vector<8x256xf32>
    %c1_15 = arith.constant 1 : index
    %c0_16 = arith.constant 0 : index
    %c0_17 = arith.constant 0 : index
    %33 = vector.load %arg4[%c1_15, %c0_16, %c0_17] : memref<2x8x256xf32, #tpu.memory_space<vmem>>, vector<1x8x256xf32>
    %34 = vector.shape_cast %33 : vector<1x8x256xf32> to vector<8x256xf32>
    %35 = vector.shape_cast %32 : vector<8x256xf32> to vector<1x8x256xf32>
    tpu.vector_store %arg4[%c1_15, %c0_16, %c0_17], %35 {strides = array<i32>} : memref<2x8x256xf32, #tpu.memory_space<vmem>>, vector<1x8x256xf32>,
    return
  }
  func.func @transform_0(%arg0: i32) -> (i32, i32) {
    %c0_i32 = arith.constant 0 : i32
    %c0_i32_0 = arith.constant 0 : i32
    %c0_i32_1 = arith.constant 0 : i32
    return %c0_i32, %c0_i32_0 : i32, i32
  }
  func.func @transform_1(%arg0: i32) -> (i32, i32) {
    %c0_i32 = arith.constant 0 : i32
    %c0_i32_0 = arith.constant 0 : i32
    %c0_i32_1 = arith.constant 0 : i32
    return %c0_i32, %c0_i32_0 : i32, i32
  }
  func.func @transform_2(%arg0: i32) -> (i32, i32) {
    %c0_i32 = arith.constant 0 : i32
    %c0_i32_0 = arith.constant 0 : i32
    %c0_i32_1 = arith.constant 0 : i32
    return %c0_i32, %c0_i32_0 : i32, i32
  }
  func.func @transform_3(%arg0: i32) -> (i32, i32, i32) {
    %c0_i32 = arith.constant 0 : i32
    %c0_i32_0 = arith.constant 0 : i32
    %c0_i32_1 = arith.constant 0 : i32
    %c0_i32_2 = arith.constant 0 : i32
    return %c0_i32, %c0_i32_0, %c0_i32_1 : i32, i32, i32
  }
}

</mosaic_0001>

<bundles_post_ra>
// kernel: conv_bn_relu.1
= control target key start
LH: loop header
LB: loop body
LE: loop exit
PB: predicated region body
PF: predicated region fallthrough
CT: control target
= control target key end

     0   :  { %vm39_vm0 = vcmask 1043456   ;;  %vm35_vm1 = vcmask 293888   ;;  %v218_v37 = vmov 0   ;;  %s219_s27 = smov 1   ;;  %v220_v53 = vmov 1   ;;  %s319_s0 = inlined_call_operand.vmem [shape: f32[36,512], index: 0, kind: input, shape index: {}]   ;;  %s320_s1 = inlined_call_operand.vmem [shape: f32[8,36], index: 1, kind: input, shape index: {}]   ;;  %s321_s2 = inlined_call_operand.vmem [shape: f32[8,2], index: 2, kind: input, shape index: {}]   ;;  %s322_s3 = inlined_call_operand.vmem [shape: f32[2,8,256], index: 3, kind: output, shape index: {}]  }
   0x1   :  { %v33_v0 = vld [vmem:[%s319_s0 + $0x90] sm:$0xf]  ;;  %v34_v2 = vld [vmem:[%s319_s0 + $0x98] sm:$0xf]  ;;  %v31_v3 = vld [vmem:[%s319_s0 + $0x80] sm:$0xf]  ;;  %213 = vset.pattern.permute.xlu1 %v218_v37  ;;  %214 = vset.pattern.permute.xlu2 %v220_v53 }
   0x2   :  { %v29_v1 = vld [vmem:[%s319_s0 + $0x70] sm:$0xff]  ;;  %204 = vmatpush.msk.msra.mxu2 %vm39_vm0, %v33_v0  ;;  %206 = vmatpush.msk.msra.mxu3 %vm39_vm0, %v34_v2  ;;  %v32_v4 = vld [vmem:[%s319_s0 + $0x88] sm:$0xf]  ;;  %v30_v6 = vld [vmem:[%s319_s0 + $0x78] sm:$0xff] }
   0x3   :  { %v25_v5 = vld [vmem:[%s319_s0 + $0x50] sm:$0xff]  ;;  %200 = vmatpush.msk.msra.mxu0 %vm39_vm0, %v31_v3  ;;  %202 = vmatpush.msk.msra.mxu1 %vm39_vm0, %v32_v4  ;;  %v27_v7 = vld [vmem:[%s319_s0 + $0x60] sm:$0xff]  ;;  %v28_v8 = vld [vmem:[%s319_s0 + $0x68] sm:$0xff] }
   0x4   :  { %104 = vmatpush.msra.mxu2 %v29_v1  ;;  %124 = vmatpush.msra.mxu3 %v30_v6  ;;  %v26_v9 = vld [vmem:[%s319_s0 + $0x58] sm:$0xff]  ;;  %v23_v10 = vld [vmem:[%s319_s0 + $0x40] sm:$0xff]  ;;  %v21_v11 = vld [vmem:[%s319_s0 + $0x30] sm:$0xff] }
   0x5   :  { %64 = vmatpush.msra.mxu0 %v27_v7  ;;  %84 = vmatpush.msra.mxu1 %v28_v8  ;;  %v24_v12 = vld [vmem:[%s319_s0 + $0x48] sm:$0xff]  ;;  %v22_v13 = vld [vmem:[%s319_s0 + $0x38] sm:$0xff]  ;;  %v19_v14 = vld [vmem:[%s319_s0 + $0x20] sm:$0xff] }
   0x6   :  { %105 = vmatpush.msra.mxu2 %v25_v5  ;;  %125 = vmatpush.msra.mxu3 %v26_v9  ;;  %v20_v15 = vld [vmem:[%s319_s0 + $0x28] sm:$0xff]  ;;  %v17_v16 = vld [vmem:[%s319_s0 + $0x10] sm:$0xff]  ;;  %v18_v17 = vld [vmem:[%s319_s0 + $0x18] sm:$0xff] }
   0x7   :  { %65 = vmatpush.msra.mxu0 %v23_v10  ;;  %85 = vmatpush.msra.mxu1 %v24_v12  ;;  %v14_v18 = vld [vmem:[%s320_s1] sm:$0xff]  ;;  %v16_v20 = vld [vmem:[%s319_s0 + $0x8] sm:$0xff] }
   0x8   :  { %106 = vmatpush.msra.mxu2 %v21_v11  ;;  %126 = vmatpush.msra.mxu3 %v22_v13  ;;  %v15_v19 = vld [vmem:[%s319_s0] sm:$0xff] }
   0x9   :  { %66 = vmatpush.msra.mxu0 %v19_v14  ;;  %86 = vmatpush.msra.mxu1 %v20_v15  ;;  %v150_v48 = vld [vmem:[%s321_s2] sm:$0xff] }
   0xa   :  { %107 = vmatpush.msra.mxu2 %v17_v16  ;;  %127 = vmatpush.msra.mxu3 %v18_v17 }
   0xb   :  { %205 = vmatmul.msk.f32.vlgmr.msra.gmra.mxu2 %vm35_vm1, %v14_v18  ;;  %207 = vmatmul.msk.f32.vlgmr.msra.gmra.mxu3 %vm35_vm1, %v14_v18 }
   0xc   :  { %67 = vmatpush.msra.mxu0 %v15_v19  ;;  %87 = vmatpush.msra.mxu1 %v16_v20 }
   0xd   :  { %201 = vmatmul.msk.f32.vlgmr.msra.gmra.mxu0 %vm35_vm1, %v14_v18  ;;  %203 = vmatmul.msk.f32.vlgmr.msra.gmra.mxu1 %vm35_vm1, %v14_v18 }
   0xe   :  { %215 = vset.pattern.permute.xlu0 %v220_v53 }
  0x8a   :  { %v69_v21 = vpop.f32.mrf.mxu0  ;;  %v89_v22 = vpop.f32.mrf.mxu1 }
  0x8b   :  { %v132_v23 = vadd.f32 %v89_v22, %v69_v21  ;;  %v138_v24 = vmul.f32 %v69_v21, %v69_v21  ;;  %v139_v25 = vmul.f32 %v89_v22, %v89_v22 }
  0x8d   :  { %v142_v29 = vadd.f32 %v139_v25, %v138_v24 }
  0x8e   :  { %v109_v26 = vpop.f32.mrf.mxu2  ;;  %v129_v27 = vpop.f32.mrf.mxu3 }
  0x8f   :  { %v133_v28 = vadd.f32 %v132_v23, %v109_v26  ;;  %v140_v30 = vmul.f32 %v109_v26, %v109_v26  ;;  %v141_v32 = vmul.f32 %v129_v27, %v129_v27 }
  0x91   :  { %v134_v31 = vadd.f32 %v133_v28, %v129_v27  ;;  %v143_v33 = vadd.f32 %v142_v29, %v140_v30 }
  0x93   :  { %135 = vadd.xlane.f32.xlu0 %v134_v31  ;;  %v144_v34 = vadd.f32 %v143_v33, %v141_v32 }
  0x9b   :  { %145 = vadd.xlane.f32.xlu0 %v144_v34 }
 0x106   :  { %v136_v35 = vpop.xlane.xlu0 %135 }
 0x107   :  { %v137_v36 = vmul.f32 0.001953125, %v136_v35 }
 0x109   :  { %v148_v39 = vmul.f32 %v137_v36, %v137_v36 }
 0x10e   :  { %v146_v38 = vpop.xlane.xlu0 %145 }
 0x10f   :  { %v147_v40 = vmul.f32 0.001953125, %v146_v38 }
 0x111   :  { %v149_v41 = vsub.f32 %v147_v40, %v148_v39 }
 0x113   :  { %v151_v42 = vadd.f32 1e-05, %v149_v41 }
 0x115   :  { %216 = vrsqrt.f32 %v151_v42  ;;  %vm158_vm3 = vweird.f32 %v151_v42 }
 0x11b   :  { %v217_v43 = vpop.eup %216 }
 0x11c   :  { %v153_v44 = vmul.f32 %v217_v43, %v151_v42  ;;  %vm159_vm2 = vweird.f32 %v217_v43 }
 0x11d   :  { %vm160_vm4 = vmor %vm158_vm3, %vm159_vm2 }
 0x11e   :  { %v154_v45 = vmul.f32 %v217_v43, %v153_v44 }
 0x120   :  { %v155_v46 = vmul.f32 0.5, %v154_v45 }
 0x122   :  { %v156_v47 = vsub.f32 1.5, %v155_v46 }
 0x124   :  { %v157_v49 = vmul.f32 %v217_v43, %v156_v47 }
 0x126   :  { %v161_v50 = vsel %vm160_vm4, %v217_v43, %v157_v49 }
 0x127   :  { %v162_v51 = vmul.f32 %v161_v50, %v150_v48 }
 0x129   :  { %v163_v52 = vmul.f32 %v162_v51, %v137_v36 }
 0x12b   :  { %165 = vrot.lane.b32.xlu1 %v163_v52, %s219_s27 }
 0x133   :  { %171 = vperm.xlu1 %213, %v162_v51  }
 0x19d   :  { %v166_v54 = vpop.permute.xlu1 %165 }
 0x19e   :  { %v168_v55 = vsub.f32 %v150_v48, %v166_v54 }
 0x1a0   :  { %180 = vperm.xlu2 %214, %v168_v55  }
 0x1a5   :  { %v172_v56 = vpop.permute.xlu1 %171 }
 0x1a6   :  { %v174_v57 = vmul.f32 %v172_v56, %v69_v21  ;;  %v175_v58 = vmul.f32 %v172_v56, %v89_v22  ;;  %v176_v59 = vmul.f32 %v172_v56, %v109_v26  ;;  %v177_v60 = vmul.f32 %v172_v56, %v129_v27 }
 0x1fa   :  { %v181_v61 = vpop.permute.xlu2 %180 }
 0x1fb   :  { %v183_v62 = vadd.f32 %v181_v61, %v174_v57  ;;  %v184_v63 = vadd.f32 %v181_v61, %v175_v58  ;;  %v185_v0 = vadd.f32 %v181_v61, %v176_v59  ;;  %v186_v1 = vadd.f32 %v181_v61, %v177_v60 }
 0x1fd   :  { %v187_v2 = vmax.f32 %v183_v62, 0.0  ;;  %v188_v3 = vmax.f32 %v184_v63, 0.0  ;;  %v189_v4 = vmax.f32 %v185_v0, 0.0  ;;  %v190_v5 = vmax.f32 %v186_v1, 0.0 }
 0x1ff   :  { %191 = vst [vmem:[%s322_s3] sm:$0xff] %v187_v2 }
 0x200   :  { %192 = vst [vmem:[%s322_s3 + $0x8] sm:$0xff] %v188_v3 }
 0x201   :  { %208 = vst [vmem:[%s322_s3 + $0x10] sm:$0xff] %v189_v4 }
 0x202   :  { %209 = vst [vmem:[%s322_s3 + $0x18] sm:$0xff] %v190_v5 }

</bundles_post_ra>
